<compile_context>
chip_gen: v5e
topology: v5e:2x2
jax: 0.10.0
libtpu: 0.0.40
codegen_flags: <defaults>
</compile_context>

<pallas_src>
import functools

import jax
import jax.numpy as jnp
from jax.experimental import pallas as pl
from jax.experimental.pallas import tpu as pltpu


def _round_up(a, b):
    return ((a + b - 1) // b) * b


@functools.lru_cache(maxsize=None)
def _chip_config():
    """Per-generation tiling defaults: block_bytes / two_core / bf16_vpu."""
    kind = ""
    try:
        dev = jax.devices()[0]
        if dev.platform == "tpu":
            kind = dev.device_kind.lower()
    except Exception:
        pass
    if "v7" in kind:
        # ~3.2 TB/s HBM, 64 MiB VMEM per TC, 2 TCs: big blocks + >=2 grid steps.
        return {"block_bytes": 8 << 20, "two_core": True, "bf16_vpu": True}
    if "v6" in kind:
        return {"block_bytes": 4 << 20, "two_core": False, "bf16_vpu": True}
    if "v4" in kind or ("v5" in kind and "lite" not in kind and "5e" not in kind):
        # v4 / v5p megacore: 2 TensorCores, no bf16 VPU.
        return {"block_bytes": 4 << 20, "two_core": True, "bf16_vpu": False}
    # v5e / unknown: conservative (16 MiB scoped-VMEM default).
    return {"block_bytes": 2 << 20, "two_core": False, "bf16_vpu": False}


# ---------------------------------------------------------------------------
# Kernel: y = min(max(x + 3, 0), 6) / 6    (elementwise, VPU only)
# ---------------------------------------------------------------------------
def _make_kernel(compute_dtype):
    def kernel(x_ref, o_ref):
        x = x_ref[...].astype(compute_dtype)
        y = jnp.minimum(jnp.maximum(x + 3.0, 0.0), 6.0) / 6.0
        o_ref[...] = y.astype(o_ref.dtype)
    return kernel


def _h_sigmoid_2d(x2d, *, compute_dtype, block_bytes, two_core):
    """h_sigmoid on a lane-dense (rows, lanes) slab; lanes is a multiple of 128."""
    rows, lanes = x2d.shape
    itemsize = x2d.dtype.itemsize
    pack = max(8, 32 // itemsize)          # sublane packing: 8 f32, 16 bf16, 32 int8

    max_tile_rows = max(pack, (block_bytes // (lanes * itemsize)) // pack * pack)

    if rows <= max_tile_rows:
        if two_core and rows >= 2 * pack:
            # Guarantee >=2 grid steps so both TensorCores get work.
            tile_rows = _round_up(pl.cdiv(rows, 2), pack)
        else:
            tile_rows = rows               # single full-array block (always legal)
    else:
        tile_rows = max_tile_rows

    # Last block may be partial; Pallas clips reads and masks out-of-bounds writes.
    grid = pl.cdiv(rows, tile_rows)

    block_b = tile_rows * lanes * itemsize
    needed = 4 * block_b + (2 << 20)       # double-buffered in + out, plus margin
    vmem_limit = needed if needed > (16 << 20) else None

    n_el = rows * lanes
    return pl.pallas_call(
        _make_kernel(compute_dtype),
        out_shape=jax.ShapeDtypeStruct((rows, lanes), x2d.dtype),
        grid=(grid,),
        in_specs=[pl.BlockSpec((tile_rows, lanes), lambda i: (i, 0))],
        out_specs=pl.BlockSpec((tile_rows, lanes), lambda i: (i, 0)),
        compiler_params=pltpu.CompilerParams(
            dimension_semantics=("parallel",),
            vmem_limit_bytes=vmem_limit),
        cost_estimate=pl.CostEstimate(
            flops=4 * n_el,
            transcendentals=0,
            bytes_accessed=2 * n_el * itemsize),
    )(x2d)


# ---------------------------------------------------------------------------
# Wrapper: lane-dense reshape (no pad / no slice for 128-multiple sizes),
# kernel-on-bulk + jnp tail for truly ragged sizes.
# ---------------------------------------------------------------------------
def h_sigmoid(x):
    """y = relu6(x + 3) / 6, elementwise; output dtype/shape == input."""
    orig_shape = x.shape
    dtype = x.dtype
    n = int(x.size)
    if n == 0:
        return x

    cfg = _chip_config()
    compute_dtype = (jnp.bfloat16
                     if (dtype == jnp.bfloat16 and cfg["bf16_vpu"])
                     else jnp.float32)

    # Widest lane count (multiple of 128) that divides n exactly -> zero-copy path.
    lanes = next((c for c in (512, 256, 128) if n % c == 0), None)

    if lanes is not None:
        out2d = _h_sigmoid_2d(
            x.reshape(n // lanes, lanes),
            compute_dtype=compute_dtype,
            block_bytes=cfg["block_bytes"],
            two_core=cfg["two_core"])
        return out2d.reshape(orig_shape)

    # Ragged size: kernel on the 512-aligned bulk, plain jnp on the tiny tail.
    flat = x.reshape(-1)
    bulk = (n // 512) * 512
    tail = flat[bulk:]
    tail_out = (jnp.clip(tail.astype(jnp.float32) + 3.0, 0.0, 6.0) / 6.0).astype(dtype)
    if bulk == 0:
        return tail_out.reshape(orig_shape)
    bulk_out = _h_sigmoid_2d(
        flat[:bulk].reshape(bulk // 512, 512),
        compute_dtype=compute_dtype,
        block_bytes=cfg["block_bytes"],
        two_core=cfg["two_core"])
    return jnp.concatenate([bulk_out.reshape(-1), tail_out]).reshape(orig_shape)


# ---------------------------------------------------------------------------
# Pure-JAX reference (mirrors the PyTorch forward) for verification.
# ---------------------------------------------------------------------------
def h_sigmoid_ref(x):
    return jnp.clip(x.astype(jnp.float32) + 3.0, 0.0, 6.0) / 6.0


if __name__ == "__main__":
    # Primary: small conv-style activation (B, C, H, W) = (2, 4, 16, 16).
    x = jax.random.normal(jax.random.PRNGKey(0), (2, 4, 16, 16), jnp.float32) * 4.0
    out = jax.block_until_ready(h_sigmoid(x))
    ref = h_sigmoid_ref(x)
    assert out.shape == x.shape and out.dtype == x.dtype
    err = float(jnp.max(jnp.abs(out - ref)))
    assert err < 1e-6, f"primary mismatch: {err}"

    # Ragged size: kernel on the 512-aligned bulk + jnp tail.
    x2 = jax.random.normal(jax.random.PRNGKey(1), (7, 300), jnp.float32) * 4.0
    out2 = jax.block_until_ready(h_sigmoid(x2))
    err2 = float(jnp.max(jnp.abs(out2 - h_sigmoid_ref(x2))))
    assert err2 < 1e-6, f"ragged mismatch: {err2}"

    # Tiny all-tail shape (pure-jnp fallback path).
    x3 = jax.random.normal(jax.random.PRNGKey(2), (3, 5, 7), jnp.float32) * 4.0
    out3 = jax.block_until_ready(h_sigmoid(x3))
    err3 = float(jnp.max(jnp.abs(out3 - h_sigmoid_ref(x3))))
    assert err3 < 1e-6, f"tail-only mismatch: {err3}"

    # bf16 path (dtype-aware sublane packing / compute dtype).
    x4 = (jax.random.normal(jax.random.PRNGKey(3), (2, 4, 16, 16), jnp.float32) * 4.0
          ).astype(jnp.bfloat16)
    out4 = jax.block_until_ready(h_sigmoid(x4))
    assert out4.dtype == jnp.bfloat16
    err4 = float(jnp.max(jnp.abs(out4.astype(jnp.float32) -
                                 h_sigmoid_ref(x4))))
    assert err4 < 2e-2, f"bf16 mismatch: {err4}"

    # Multi-step grid with a partial last block, and the 2-TensorCore split,
    # forced via small block_bytes so the test stays tiny on every generation.
    x5 = jax.random.normal(jax.random.PRNGKey(4), (20, 512), jnp.float32) * 4.0
    ref5 = h_sigmoid_ref(x5)
    out5a = jax.block_until_ready(_h_sigmoid_2d(
        x5, compute_dtype=jnp.float32, block_bytes=8 * 512 * 4, two_core=False))
    err5a = float(jnp.max(jnp.abs(out5a - ref5)))
    assert err5a < 1e-6, f"partial-block mismatch: {err5a}"
    out5b = jax.block_until_ready(_h_sigmoid_2d(
        x5, compute_dtype=jnp.float32, block_bytes=2 << 20, two_core=True))
    err5b = float(jnp.max(jnp.abs(out5b - ref5)))
    assert err5b < 1e-6, f"two-core-split mismatch: {err5b}"

    print("KERNEL_OK")
</pallas_src>

<mosaic_0001>
module attributes {stable_mosaic.version = 11 : i64} {
  func.func @kernel(%arg0: i32, %arg1: memref<4x512xf32, #tpu.memory_space<vmem>>, %arg2: memref<4x512xf32, #tpu.memory_space<vmem>>) attributes {dimension_semantics = [#tpu.dimension_semantics<parallel>], iteration_bounds = array<i64: 1>, scalar_prefetch = 0 : i64, scratch_operands = 0 : i64, tpu.core_type = #tpu.core_type<tc>, window_params = [{transform_indices = @transform_0, window_bounds = array<i64: 4, 512>}, {transform_indices = @transform_1, window_bounds = array<i64: 4, 512>}]} {
    %c0 = arith.constant 0 : index
    %c0_0 = arith.constant 0 : index
    %0 = vector.load %arg1[%c0, %c0_0] : memref<4x512xf32, #tpu.memory_space<vmem>>, vector<4x512xf32>
    %cst = arith.constant 3.000000e+00 : f32
    %1 = vector.broadcast %cst : f32 to vector<4x512xf32>
    %2 = arith.addf %0, %1 : vector<4x512xf32>
    %cst_1 = arith.constant 0.000000e+00 : f32
    %3 = vector.broadcast %cst_1 : f32 to vector<4x512xf32>
    %4 = arith.maximumf %2, %3 : vector<4x512xf32>
    %cst_2 = arith.constant 6.000000e+00 : f32
    %5 = vector.broadcast %cst_2 : f32 to vector<4x512xf32>
    %6 = arith.minimumf %4, %5 : vector<4x512xf32>
    %cst_3 = arith.constant 6.000000e+00 : f32
    %7 = vector.broadcast %cst_3 : f32 to vector<4x512xf32>
    %8 = arith.divf %6, %7 : vector<4x512xf32>
    %c0_4 = arith.constant 0 : index
    %c0_5 = arith.constant 0 : index
    %9 = vector.load %arg2[%c0_4, %c0_5] : memref<4x512xf32, #tpu.memory_space<vmem>>, vector<4x512xf32>
    tpu.vector_store %arg2[%c0_4, %c0_5], %8 {strides = array<i32>} : memref<4x512xf32, #tpu.memory_space<vmem>>, vector<4x512xf32>,
    return
  }
  func.func @transform_0(%arg0: i32) -> (i32, i32) {
    %c0_i32 = arith.constant 0 : i32
    %c0_i32_0 = arith.constant 0 : i32
    return %arg0, %c0_i32 : i32, i32
  }
  func.func @transform_1(%arg0: i32) -> (i32, i32) {
    %c0_i32 = arith.constant 0 : i32
    %c0_i32_0 = arith.constant 0 : i32
    return %arg0, %c0_i32 : i32, i32
  }
}

</mosaic_0001>

<bundles_post_ra>
// kernel: tpu_custom_call.1
= control target key start
LH: loop header
LB: loop body
LE: loop exit
PB: predicated region body
PF: predicated region fallthrough
CT: control target
= control target key end

     0   :  { %6 = vsyncpa [#allocation3], 0  ;;  %s135_s0 = inlined_call_operand.hbm [shape: f32[4,512], index: 0, kind: input, shape index: {}]   ;;  %s136_s1 = inlined_call_operand.hbm [shape: f32[4,512], index: 1, kind: output, shape index: {}]  }
   0x1   :  { %7 = vsyncpa [#allocation4], 0  ;;  %s13_s8 = sshll.u32 %s135_s0, 4  ;;  %s116_s9 = smov [#allocation2]   ;;  %s14_s8 = int_to_ptr.hbm [resolvable:$true] %s13_s8 }
   0x2   :  { %s15_s10 = sshll.u32 %s116_s9, 4  ;;  %s16_s10 = int_to_ptr.vmem [resolvable:$true] %s15_s10 }
   0x3   :  { %18 = dma.hbm_to_vmem [thread:$0]  %s14_s8, 256, %s16_s10, [#allocation3]  }
   0x4   :  { %112 = dma.done.wait [#allocation3], 256  }
   0x5   :  { %113 = vsyncadd [#allocation3], 4294967040  ;;  %v117_v0 = vmov 6.0   ;;  %v23_v2 = vld [vmem:[#allocation2] sm:$0xff]  ;;  %v24_v3 = vld [vmem:[#allocation2 + $0x8] sm:$0xff]  ;;  %s118_s0 = smov [#allocation5]  }
   0x6   :  { %62 = vrcp.f32 %v117_v0  ;;  %v25_v4 = vadd.f32 3.0, %v23_v2  ;;  %v26_v6 = vadd.f32 3.0, %v24_v3  ;;  %s47_s11 = sshll.u32 %s118_s0, 4  ;;  %s49_s14 = sshll.u32 %s136_s1, 4  ;;  %s48_s11 = int_to_ptr.vmem [resolvable:$true] %s47_s11  ;;  %s50_s14 = int_to_ptr.hbm [resolvable:$true] %s49_s14 }
   0x8   :  { %v27_v7 = vmax.f32 %v25_v4, 0.0  ;;  %v28_v9 = vmax.f32 %v26_v6, 0.0 }
   0xa   :  { %v29_v11 = vmin.f32 %v27_v7, 6.0  ;;  %v30_v12 = vmin.f32 %v28_v9, 6.0 }
   0xc   :  { %v63_v1 = vpop.eup %62 }
   0xd   :  { %v32_v5 = vmul.f32 6.0, %v63_v1  ;;  %vm36_vm0 = vweird.f32 %v63_v1 }
   0xf   :  { %v33_v8 = vsub.f32 1.0, %v32_v5 }
  0x11   :  { %v34_v10 = vmul.f32 %v63_v1, %v33_v8 }
  0x13   :  { %v35_v13 = vadd.f32 %v63_v1, %v34_v10 }
  0x15   :  { %v37_v14 = vsel %vm36_vm0, %v63_v1, %v35_v13 }
  0x16   :  { %v38_v15 = vmul.f32 %v37_v14, %v29_v11  ;;  %v39_v16 = vmul.f32 %v37_v14, %v30_v12 }
  0x18   :  { %40 = vst [vmem:[#allocation5] sm:$0xff] %v38_v15 }
  0x19   :  { %41 = vst [vmem:[#allocation5 + $0x8] sm:$0xff] %v39_v16 }
  0x1a   :  { %52 = dma.vmem_to_hbm [thread:$0]  %s48_s11, 256, %s50_s14, [#allocation4]  }
  0x1b   :  { %114 = dma.done.wait [#allocation4], 256  }
  0x1c   :  { %115 = vsyncadd [#allocation4], 4294967040 }
  0x1d   :  { %57 = vsyncpa [#allocation3], 1 }
  0x1e   :  { %58 = vsyncpa [#allocation4], 1 }

</bundles_post_ra>
